<compile_context>
chip_gen: v5e
topology: v5e:2x2
jax: 0.10.0
libtpu: 0.0.40
codegen_flags: <defaults>
</compile_context>

<pallas_src>
import functools

import jax
import jax.numpy as jnp
from jax import lax
from jax.experimental import pallas as pl
from jax.experimental.pallas import tpu as pltpu


def _round_up(x, m):
    return ((x + m - 1) // m) * m


def _mface_kernel(coef_ref, tgt_ref, cos_ref, phi_ref,
                  otgt_ref, logpt_ref,
                  m_sc, l_sc, g_sc,
                  *, num_classes, mask_cols):
    """Grid = (batch_tiles, class_tiles); class axis is an online logsumexp."""
    k = pl.program_id(1)
    nc = pl.num_programs(1)

    @pl.when(k == 0)
    def _():
        m_sc[...] = jnp.full_like(m_sc, -jnp.inf)
        l_sc[...] = jnp.zeros_like(l_sc)
        g_sc[...] = jnp.zeros_like(g_sc)

    cos = cos_ref[...].astype(jnp.float32)        # [TB, TC]
    phi = phi_ref[...].astype(jnp.float32)        # [TB, TC]
    tgt = tgt_ref[...]                            # [TB, 1] int32
    coef = coef_ref[0]                            # runtime scalar 1/(1+lamb)

    tb, tc = cos.shape
    col = lax.broadcasted_iota(jnp.int32, (tb, tc), 1) + k * tc
    onehot = col == tgt                           # one-hot scatter mask

    # Fused margin mixing: output = cos everywhere except the target column,
    # where output = cos + coef * (phi - cos).  Gather the target logit in the
    # same pass (padded target rows hit column 0; they are sliced off outside).
    mixed = cos + jnp.where(onehot, coef * (phi - cos), 0.0)
    g_sc[...] += jnp.sum(jnp.where(onehot, mixed, 0.0), axis=1, keepdims=True)

    # Mask padded classes of the ragged last tile out of the logsumexp.
    if mask_cols:
        s = jnp.where(col < num_classes, mixed, -jnp.inf)
    else:
        s = mixed

    m_prev = m_sc[...]
    m_new = jnp.maximum(m_prev, jnp.max(s, axis=1, keepdims=True))
    alpha = jnp.exp(m_prev - m_new)
    l_sc[...] = alpha * l_sc[...] + jnp.sum(jnp.exp(s - m_new), axis=1,
                                            keepdims=True)
    m_sc[...] = m_new

    @pl.when(k == nc - 1)
    def _():
        lse = m_sc[...] + jnp.log(l_sc[...])
        otgt_ref[...] = g_sc[...]                 # output.gather(1, target)
        logpt_ref[...] = g_sc[...] - lse          # log_softmax gathered


def mface_loss(cos_theta, phi_theta, target, quality, *, it=1, gamma=0,
               tile_b=256, tile_c=2048):
    """MFaceLoss forward.  `it` mimics the module's per-call counter (>= 1)."""
    assert cos_theta.shape == phi_theta.shape
    B, C = cos_theta.shape

    # Runtime scalar (traced): changing `it` per training step does NOT
    # recompile the kernel.
    it_f = jnp.asarray(it, jnp.float32)
    lamb = jnp.maximum(5.0, 1500.0 / (1.0 + 0.1 * it_f))
    coef = (1.0 / (1.0 + lamb)).reshape(1).astype(jnp.float32)

    target = jnp.asarray(target).reshape(-1, 1).astype(jnp.int32)     # [B, 1]
    quality = jnp.asarray(quality).reshape(-1).astype(jnp.float32)    # [B]

    # Tile sizes: multiples of (8, 128), clamped to the (rounded) problem size.
    tb = min(_round_up(tile_b, 8), _round_up(B, 8))
    tc = min(_round_up(tile_c, 128), _round_up(C, 128))
    bp = _round_up(B, tb)
    cp = _round_up(C, tc)

    cos_in, phi_in, tgt_in = cos_theta, phi_theta, target
    if bp != B or cp != C:
        cos_in = jnp.pad(cos_in, ((0, bp - B), (0, cp - C)))
        phi_in = jnp.pad(phi_in, ((0, bp - B), (0, cp - C)))
    if bp != B:
        tgt_in = jnp.pad(tgt_in, ((0, bp - B), (0, 0)))

    grid = (bp // tb, cp // tc)
    kernel = functools.partial(_mface_kernel, num_classes=C,
                               mask_cols=(cp != C))

    o_tgt_pad, logpt_pad = pl.pallas_call(
        kernel,
        grid=grid,
        in_specs=[
            pl.BlockSpec(memory_space=pltpu.MemorySpace.SMEM),     # coef scalar
            pl.BlockSpec((tb, 1), lambda i, k: (i, 0)),            # target
            pl.BlockSpec((tb, tc), lambda i, k: (i, k)),           # cos_theta
            pl.BlockSpec((tb, tc), lambda i, k: (i, k)),           # phi_theta
        ],
        out_specs=(
            pl.BlockSpec((tb, 1), lambda i, k: (i, 0)),            # o_target
            pl.BlockSpec((tb, 1), lambda i, k: (i, 0)),            # logpt
        ),
        out_shape=(
            jax.ShapeDtypeStruct((bp, 1), jnp.float32),
            jax.ShapeDtypeStruct((bp, 1), jnp.float32),
        ),
        scratch_shapes=[
            pltpu.VMEM((tb, 1), jnp.float32),   # running max m
            pltpu.VMEM((tb, 1), jnp.float32),   # running sum l
            pltpu.VMEM((tb, 1), jnp.float32),   # gathered target logit
        ],
        compiler_params=pltpu.CompilerParams(
            dimension_semantics=("parallel", "arbitrary")),
    )(coef, tgt_in, cos_in, phi_in)

    o_tgt = o_tgt_pad[:B, 0]
    logpt = logpt_pad[:B, 0]

    # Focal term; gamma == 0 in the module, so pt is not even computed then.
    if gamma == 0:
        loss_focal = jnp.mean(-logpt)
    else:
        pt = jnp.exp(logpt)
        loss_focal = jnp.mean(-((1.0 - pt) ** gamma) * logpt)

    # Quality term: sum_{i,j} (o_j - q_i)^2 / B  (PyTorch [B] - [B,1] broadcast),
    # evaluated in closed form from O(B) sums.
    b_f = jnp.float32(B)
    sum_o = jnp.sum(o_tgt)
    sum_o2 = jnp.sum(o_tgt * o_tgt)
    sum_q = jnp.sum(quality)
    sum_q2 = jnp.sum(quality * quality)
    loss_quality = sum_o2 - 2.0 * sum_o * sum_q / b_f + sum_q2

    return loss_focal + loss_quality


def _mface_loss_ref(cos_theta, phi_theta, target, quality, *, it=1, gamma=0):
    """Pure-JAX reference mirroring the PyTorch code (for sanity check)."""
    B, C = cos_theta.shape
    lamb = max(5.0, 1500.0 / (1.0 + 0.1 * it))
    target = jnp.asarray(target).reshape(-1)
    quality = jnp.asarray(quality).reshape(-1, 1).astype(jnp.float32)
    mask = jax.nn.one_hot(target, C, dtype=bool)
    coef = 1.0 / (1.0 + lamb)
    out = jnp.where(mask, cos_theta + coef * (phi_theta - cos_theta), cos_theta)
    logsm = jax.nn.log_softmax(out, axis=1)
    logpt = jnp.take_along_axis(logsm, target[:, None], axis=1).reshape(-1)
    pt = jnp.exp(logpt)
    o_tgt = jnp.take_along_axis(out, target[:, None], axis=1).reshape(-1)
    loss_quality = jnp.sum(jnp.square(o_tgt[None, :] - quality)) / B
    loss = (-1.0 * (1.0 - pt) ** gamma * logpt).mean() + loss_quality
    return loss


if __name__ == "__main__":
    key = jax.random.PRNGKey(0)
    k1, k2, k3, k4 = jax.random.split(key, 4)

    B, C = 24, 560  # batch, number of identities (classes); ragged class tail
    cos_theta = jax.random.uniform(k1, (B, C), jnp.float32, -1.0, 1.0)
    phi_theta = jax.random.uniform(k2, (B, C), jnp.float32, -2.0, 1.0)
    target = jax.random.randint(k3, (B, 1), 0, C, dtype=jnp.int32)
    quality = jax.random.uniform(k4, (B, 1), jnp.float32, 0.0, 1.0)

    # Multi-tile path: 3 batch tiles x 5 class tiles, online logsumexp across
    # class tiles, ragged last class tile (560 -> 640) masked in-kernel.
    loss = mface_loss(cos_theta, phi_theta, target, quality, it=1,
                      tile_b=8, tile_c=128)
    jax.block_until_ready(loss)
    ref = _mface_loss_ref(cos_theta, phi_theta, target, quality, it=1)
    assert jnp.allclose(loss, ref, rtol=1e-4, atol=1e-4), (loss, ref)

    # Single-tile path with default tile sizes and a different step counter.
    loss2 = mface_loss(cos_theta[:8, :256], phi_theta[:8, :256],
                       target[:8] % 256, quality[:8], it=3)
    jax.block_until_ready(loss2)
    ref2 = _mface_loss_ref(cos_theta[:8, :256], phi_theta[:8, :256],
                           target[:8] % 256, quality[:8], it=3)
    assert jnp.allclose(loss2, ref2, rtol=1e-4, atol=1e-4), (loss2, ref2)

    print("KERNEL_OK")
</pallas_src>

<mosaic_0001>
module attributes {stable_mosaic.version = 11 : i64} {
  func.func @_mface_kernel(%arg0: i32, %arg1: i32, %arg2: memref<1xf32, #tpu.memory_space<smem>>, %arg3: memref<8x1xi32, #tpu.memory_space<vmem>>, %arg4: memref<8x128xf32, #tpu.memory_space<vmem>>, %arg5: memref<8x128xf32, #tpu.memory_space<vmem>>, %arg6: memref<8x1xf32, #tpu.memory_space<vmem>>, %arg7: memref<8x1xf32, #tpu.memory_space<vmem>>, %arg8: memref<8x1xf32, #tpu.memory_space<vmem>>, %arg9: memref<8x1xf32, #tpu.memory_space<vmem>>, %arg10: memref<8x1xf32, #tpu.memory_space<vmem>>) attributes {dimension_semantics = [#tpu.dimension_semantics<parallel>, #tpu.dimension_semantics<arbitrary>], iteration_bounds = array<i64: 3, 5>, scalar_prefetch = 0 : i64, scratch_operands = 3 : i64, tpu.core_type = #tpu.core_type<tc>, window_params = [{transform_indices = @transform_0, window_bounds = array<i64: 1>}, {transform_indices = @transform_1, window_bounds = array<i64: 8, 1>}, {transform_indices = @transform_2, window_bounds = array<i64: 8, 128>}, {transform_indices = @transform_3, window_bounds = array<i64: 8, 128>}, {transform_indices = @transform_4, window_bounds = array<i64: 8, 1>}, {transform_indices = @transform_5, window_bounds = array<i64: 8, 1>}]} {
    %c0_i32 = arith.constant 0 : i32
    %0 = arith.cmpi eq, %arg1, %c0_i32 : i32
    %1 = arith.extui %0 : i1 to i32
    %c0_i32_0 = arith.constant 0 : i32
    %2 = arith.cmpi ne, %1, %c0_i32_0 : i32
    scf.if %2 {
      %cst_25 = arith.constant 0xFF800000 : f32
      %49 = vector.broadcast %cst_25 : f32 to vector<8x1xf32>
      %c0_26 = arith.constant 0 : index
      %c0_27 = arith.constant 0 : index
      %50 = vector.load %arg8[%c0_26, %c0_27] : memref<8x1xf32, #tpu.memory_space<vmem>>, vector<8x1xf32>
      tpu.vector_store %arg8[%c0_26, %c0_27], %49 {strides = array<i32>} : memref<8x1xf32, #tpu.memory_space<vmem>>, vector<8x1xf32>,
      %cst_28 = arith.constant 0.000000e+00 : f32
      %51 = vector.broadcast %cst_28 : f32 to vector<8x1xf32>
      %c0_29 = arith.constant 0 : index
      %c0_30 = arith.constant 0 : index
      %52 = vector.load %arg9[%c0_29, %c0_30] : memref<8x1xf32, #tpu.memory_space<vmem>>, vector<8x1xf32>
      tpu.vector_store %arg9[%c0_29, %c0_30], %51 {strides = array<i32>} : memref<8x1xf32, #tpu.memory_space<vmem>>, vector<8x1xf32>,
      %cst_31 = arith.constant 0.000000e+00 : f32
      %53 = vector.broadcast %cst_31 : f32 to vector<8x1xf32>
      %c0_32 = arith.constant 0 : index
      %c0_33 = arith.constant 0 : index
      %54 = vector.load %arg10[%c0_32, %c0_33] : memref<8x1xf32, #tpu.memory_space<vmem>>, vector<8x1xf32>
      tpu.vector_store %arg10[%c0_32, %c0_33], %53 {strides = array<i32>} : memref<8x1xf32, #tpu.memory_space<vmem>>, vector<8x1xf32>,
    } else {
    }
    %c0 = arith.constant 0 : index
    %c0_1 = arith.constant 0 : index
    %3 = vector.load %arg4[%c0, %c0_1] : memref<8x128xf32, #tpu.memory_space<vmem>>, vector<8x128xf32>
    %c0_2 = arith.constant 0 : index
    %c0_3 = arith.constant 0 : index
    %4 = vector.load %arg5[%c0_2, %c0_3] : memref<8x128xf32, #tpu.memory_space<vmem>>, vector<8x128xf32>
    %c0_4 = arith.constant 0 : index
    %c0_5 = arith.constant 0 : index
    %5 = vector.load %arg3[%c0_4, %c0_5] : memref<8x1xi32, #tpu.memory_space<vmem>>, vector<8x1xi32>
    %c0_6 = arith.constant 0 : index
    %6 = memref.load %arg2[%c0_6] : memref<1xf32, #tpu.memory_space<smem>>
    %7 = tpu.iota {dimensions = array<i32: 1>} : vector<8x128xi32>
    %c128_i32 = arith.constant 128 : i32
    %8 = arith.muli %arg1, %c128_i32 : i32
    %9 = vector.broadcast %8 : i32 to vector<8x128xi32>
    %10 = arith.addi %7, %9 : vector<8x128xi32>
    %11 = vector.broadcast %5 : vector<8x1xi32> to vector<8x128xi32>
    %12 = arith.cmpi eq, %10, %11 : vector<8x128xi32>
    %13 = arith.subf %4, %3 : vector<8x128xf32>
    %14 = vector.broadcast %6 : f32 to vector<8x128xf32>
    %15 = arith.mulf %14, %13 : vector<8x128xf32>
    %cst = arith.constant 0.000000e+00 : f32
    %16 = vector.broadcast %cst : f32 to vector<8x128xf32>
    %17 = arith.select %12, %15, %16 : vector<8x128xi1>, vector<8x128xf32>
    %18 = arith.addf %3, %17 : vector<8x128xf32>
    %c0_7 = arith.constant 0 : index
    %c0_8 = arith.constant 0 : index
    %19 = vector.load %arg10[%c0_7, %c0_8] : memref<8x1xf32, #tpu.memory_space<vmem>>, vector<8x1xf32>
    %cst_9 = arith.constant 0.000000e+00 : f32
    %20 = vector.broadcast %cst_9 : f32 to vector<8x128xf32>
    %21 = arith.select %12, %18, %20 : vector<8x128xi1>, vector<8x128xf32>
    %cst_10 = arith.constant dense<0.000000e+00> : vector<8xf32>
    %22 = vector.multi_reduction <add>, %21, %cst_10 [1] : vector<8x128xf32> to vector<8xf32>
    %23 = vector.shape_cast %22 : vector<8xf32> to vector<8x1xf32>
    %24 = arith.addf %19, %23 : vector<8x1xf32>
    %c0_11 = arith.constant 0 : index
    %c0_12 = arith.constant 0 : index
    %25 = vector.load %arg10[%c0_11, %c0_12] : memref<8x1xf32, #tpu.memory_space<vmem>>, vector<8x1xf32>
    tpu.vector_store %arg10[%c0_11, %c0_12], %24 {strides = array<i32>} : memref<8x1xf32, #tpu.memory_space<vmem>>, vector<8x1xf32>,
    %c560_i32 = arith.constant 560 : i32
    %26 = vector.broadcast %c560_i32 : i32 to vector<8x128xi32>
    %27 = arith.cmpi slt, %10, %26 : vector<8x128xi32>
    %cst_13 = arith.constant 0xFF800000 : f32
    %28 = vector.broadcast %cst_13 : f32 to vector<8x128xf32>
    %29 = arith.select %27, %18, %28 : vector<8x128xi1>, vector<8x128xf32>
    %c0_14 = arith.constant 0 : index
    %c0_15 = arith.constant 0 : index
    %30 = vector.load %arg8[%c0_14, %c0_15] : memref<8x1xf32, #tpu.memory_space<vmem>>, vector<8x1xf32>
    %cst_16 = arith.constant dense<0xFF800000> : vector<8xf32>
    %31 = vector.multi_reduction <maximumf>, %29, %cst_16 [1] : vector<8x128xf32> to vector<8xf32>
    %32 = vector.shape_cast %31 : vector<8xf32> to vector<8x1xf32>
    %33 = arith.maximumf %30, %32 : vector<8x1xf32>
    %34 = arith.subf %30, %33 : vector<8x1xf32>
    %35 = math.exp %34 : vector<8x1xf32>
    %c0_17 = arith.constant 0 : index
    %c0_18 = arith.constant 0 : index
    %36 = vector.load %arg9[%c0_17, %c0_18] : memref<8x1xf32, #tpu.memory_space<vmem>>, vector<8x1xf32>
    %37 = arith.mulf %35, %36 : vector<8x1xf32>
    %38 = vector.broadcast %33 : vector<8x1xf32> to vector<8x128xf32>
    %39 = arith.subf %29, %38 : vector<8x128xf32>
    %40 = math.exp %39 : vector<8x128xf32>
    %cst_19 = arith.constant dense<0.000000e+00> : vector<8xf32>
    %41 = vector.multi_reduction <add>, %40, %cst_19 [1] : vector<8x128xf32> to vector<8xf32>
    %42 = vector.shape_cast %41 : vector<8xf32> to vector<8x1xf32>
    %43 = arith.addf %37, %42 : vector<8x1xf32>
    %c0_20 = arith.constant 0 : index
    %c0_21 = arith.constant 0 : index
    %44 = vector.load %arg9[%c0_20, %c0_21] : memref<8x1xf32, #tpu.memory_space<vmem>>, vector<8x1xf32>
    tpu.vector_store %arg9[%c0_20, %c0_21], %43 {strides = array<i32>} : memref<8x1xf32, #tpu.memory_space<vmem>>, vector<8x1xf32>,
    %c0_22 = arith.constant 0 : index
    %c0_23 = arith.constant 0 : index
    %45 = vector.load %arg8[%c0_22, %c0_23] : memref<8x1xf32, #tpu.memory_space<vmem>>, vector<8x1xf32>
    tpu.vector_store %arg8[%c0_22, %c0_23], %33 {strides = array<i32>} : memref<8x1xf32, #tpu.memory_space<vmem>>, vector<8x1xf32>,
    %c4_i32 = arith.constant 4 : i32
    %46 = arith.cmpi eq, %arg1, %c4_i32 : i32
    %47 = arith.extui %46 : i1 to i32
    %c0_i32_24 = arith.constant 0 : i32
    %48 = arith.cmpi ne, %47, %c0_i32_24 : i32
    scf.if %48 {
      %c0_25 = arith.constant 0 : index
      %c0_26 = arith.constant 0 : index
      %49 = vector.load %arg8[%c0_25, %c0_26] : memref<8x1xf32, #tpu.memory_space<vmem>>, vector<8x1xf32>
      %c0_27 = arith.constant 0 : index
      %c0_28 = arith.constant 0 : index
      %50 = vector.load %arg9[%c0_27, %c0_28] : memref<8x1xf32, #tpu.memory_space<vmem>>, vector<8x1xf32>
      %51 = math.log %50 : vector<8x1xf32>
      %52 = arith.addf %49, %51 : vector<8x1xf32>
      %c0_29 = arith.constant 0 : index
      %c0_30 = arith.constant 0 : index
      %53 = vector.load %arg10[%c0_29, %c0_30] : memref<8x1xf32, #tpu.memory_space<vmem>>, vector<8x1xf32>
      %c0_31 = arith.constant 0 : index
      %c0_32 = arith.constant 0 : index
      %54 = vector.load %arg6[%c0_31, %c0_32] : memref<8x1xf32, #tpu.memory_space<vmem>>, vector<8x1xf32>
      tpu.vector_store %arg6[%c0_31, %c0_32], %53 {strides = array<i32>} : memref<8x1xf32, #tpu.memory_space<vmem>>, vector<8x1xf32>,
      %c0_33 = arith.constant 0 : index
      %c0_34 = arith.constant 0 : index
      %55 = vector.load %arg10[%c0_33, %c0_34] : memref<8x1xf32, #tpu.memory_space<vmem>>, vector<8x1xf32>
      %56 = arith.subf %55, %52 : vector<8x1xf32>
      %c0_35 = arith.constant 0 : index
      %c0_36 = arith.constant 0 : index
      %57 = vector.load %arg7[%c0_35, %c0_36] : memref<8x1xf32, #tpu.memory_space<vmem>>, vector<8x1xf32>
      tpu.vector_store %arg7[%c0_35, %c0_36], %56 {strides = array<i32>} : memref<8x1xf32, #tpu.memory_space<vmem>>, vector<8x1xf32>,
    } else {
    }
    return
  }
  func.func @transform_0(%arg0: i32, %arg1: i32) -> i32 {
    %c0_i32 = arith.constant 0 : i32
    %c0_i32_0 = arith.constant 0 : i32
    return %c0_i32 : i32
  }
  func.func @transform_1(%arg0: i32, %arg1: i32) -> (i32, i32) {
    %c0_i32 = arith.constant 0 : i32
    %c0_i32_0 = arith.constant 0 : i32
    return %arg0, %c0_i32 : i32, i32
  }
  func.func @transform_2(%arg0: i32, %arg1: i32) -> (i32, i32) {
    %c0_i32 = arith.constant 0 : i32
    return %arg0, %arg1 : i32, i32
  }
  func.func @transform_3(%arg0: i32, %arg1: i32) -> (i32, i32) {
    %c0_i32 = arith.constant 0 : i32
    return %arg0, %arg1 : i32, i32
  }
  func.func @transform_4(%arg0: i32, %arg1: i32) -> (i32, i32) {
    %c0_i32 = arith.constant 0 : i32
    %c0_i32_0 = arith.constant 0 : i32
    return %arg0, %c0_i32 : i32, i32
  }
  func.func @transform_5(%arg0: i32, %arg1: i32) -> (i32, i32) {
    %c0_i32 = arith.constant 0 : i32
    %c0_i32_0 = arith.constant 0 : i32
    return %arg0, %c0_i32 : i32, i32
  }
}

</mosaic_0001>

<bundles_post_ra>
// kernel: tpu_custom_call.1
= control target key start
LH: loop header
LB: loop body
LE: loop exit
PB: predicated region body
PF: predicated region fallthrough
CT: control target
= control target key end

     0   :  { %s983_s0 = inlined_call_operand.<no memory space> [shape: f32[1], index: 0, kind: input, shape index: {}]   ;;  %s984_s1 = inlined_call_operand.vmem [shape: s32[24,1], index: 1, kind: input, shape index: {}]   ;;  %s985_s2 = inlined_call_operand.hbm [shape: f32[24,640], index: 2, kind: input, shape index: {}]   ;;  %s986_s3 = inlined_call_operand.hbm [shape: f32[24,640], index: 3, kind: input, shape index: {}]   ;;  %s987_s4 = inlined_call_operand.vmem [shape: f32[24,1], index: 4, kind: output, shape index: {0}]   ;;  %s988_s5 = inlined_call_operand.vmem [shape: f32[24,1], index: 5, kind: output, shape index: {1}]  }
   0x1   :  { %990 = sst [smem:[#allocation13_spill]] %s985_s2 }
   0x2   :  { %11 = sst [smem:[#allocation5]] %s983_s0 }
   0x3   :  { %12 = vsyncpa [#allocation7], 0 }
   0x4   :  { %14 = vsyncpa [#allocation7 + $0x1], 0 }
   0x5   :  { %15 = vsyncpa [#allocation9], 0 }
   0x6   :  { %17 = vsyncpa [#allocation9 + $0x1], 0  ;;  %s823_s20 = smov 0   ;;  %s825_s21 = smov 0  }
   0x7   :  { %s827_s22 = smov 0   ;;  %s829_s23 = smov 0  }
   0x8   :  { %s831_s24 = smov 0   ;;  %s833_s25 = smov 0  }
   0x9   :  { %s835_s26 = smov 0   ;;  %s837_s27 = smov 0  }
   0xa LB: > { %s547_s0 = sadd.s32 4294967295, %s785_s27   ;;  %s32_s28 = sadd.s32 1, %s777_s25  ;;  %s785_s27 = sphi %s837_s27, %s23_s27   ;;  %s781_s26 = sphi %s835_s26, %s1003_s26   ;;  %s777_s25 = sphi %s833_s25, %s1002_s25   ;;  %s773_s24 = sphi %s831_s24, %s1001_s24   ;;  %s769_s23 = sphi %s829_s23, %s1000_s23   ;;  %s765_s22 = sphi %s827_s22, %s999_s22   ;;  %s761_s21 = sphi %s825_s21, %s998_s21   ;;  %s757_s20 = sphi %s823_s20, %s997_s20  }
   0xb   : > { %p33_p0 = scmp.ge.s32.totalorder %s32_s28, 5  ;;  %s35_s29 = sadd.s32 1, %s781_s26 }
   0xc   : > { %s91_s30 = sadd.s32 1, %s765_s22  ;;  %p98_p1 = scmp.ne.s32.totalorder %s765_s22, %s761_s21 }
   0xd   : > { %s1005_s28 = smov (%p33_p0, %s32_s28), 0  ;;  %s1007_s29 = smov (!%p33_p0, %s35_s29), %s781_s26 }
   0xe   : > { %s87_s6 = ssub.s32 %s777_s25, %s1005_s28  ;;  %p99_p2 = scmp.eq.s32.totalorder %s785_s27, 0 }
   0xf   : > { %p37_p3 = scmp.ge.s32.totalorder %s1007_s29, 3  ;;  %p104_p4 = scmp.ne.s32.totalorder %s761_s21, %s757_s20 }
  0x10   : > { %p874_p5 = por %p99_p2, %p98_p1  ;;  %p105_p6 = scmp.eq.s32.totalorder %s547_s0, 0 }
  0x11   : > { %s1009_s29 = smov (%p37_p3, %s1007_s29), 0  ;;  %p579_p8 = scmp.lt.s32.totalorder %s785_s27, 15 }
  0x12   : > { %992 = sst [smem:[#allocation12_spill]] %s1009_s29  ;;  %p880_p7 = por %p105_p6, %p104_p4 }
  0x13   : > { %s86_s9 = ssub.s32 %s781_s26, %s1009_s29  ;;  %s218_s11 = sand.u32 1, %s765_s22  }
  0x14   : > { %s88_s10 = sor.u32 %s87_s6, %s86_s9  ;;  %s551_s12 = sshll.u32 %s218_s11, 3 }
  0x15   : > { %p89_p9 = scmp.eq.s32.totalorder %s88_s10, 0  ;;  %s566_s13 = smul.u32 5, %s781_s26 }
  0x16   : > { %s222_s17 = scalar_lea.vmem [#allocation6], %s551_s12  ;;  %s994_s2 = sld [smem:[#allocation13_spill]] }
  0x17   : > { %s890_s14 = scalar_select %p89_p9, %s765_s22, %s91_s30  }
  0x18   : > { %s226_s15 = sadd.s32 %s777_s25, %s566_s13  ;;  %s232_s18 = sshll.u32 %s222_s17, 4  ;;  %s233_s18 = int_to_ptr.vmem [resolvable:$true] %s232_s18 }
  0x19   : > { %s552_s16 = sshll.u32 %s226_s15, 3  ;;  %p900_p10 = pnand %p579_p8, %p874_p5 }
  0x1a   : > { %p555_p11 = scmp.ge.s32.totalorder %s785_s27, 1  ;;  %p258_p12 = scmp.lt.s32.totalorder %s785_s27, 16 }
  0x1b   : > { %s219_s30 = scalar_lea.sflag [#allocation7], %s218_s11  ;;  %s249_s13 = scalar_lea.hbm %s986_s3, %s552_s16 }
  0x1c   : > { %s228_s0 = scalar_lea.hbm %s994_s2, %s552_s16  ;;  %p259_p13 = pnand %p555_p11, %p258_p12 }
  0x1d   : > { %s230_s29 = sshll.u32 %s228_s0, 4  ;;  %s251_s15 = sshll.u32 %s249_s13, 4  ;;  %s231_s29 = int_to_ptr.hbm [resolvable:$true] %s230_s29  ;;  %s252_s15 = int_to_ptr.hbm [resolvable:$true] %s251_s15 }
  0x1e   : > { %575 = dma.hbm_to_vmem [thread:$0]  (!%p900_p10), %s231_s29, 128, %s233_s18, %s219_s30  }
  0x1f   : > { %s243_s7 = scalar_lea.vmem [#allocation8], %s551_s12  ;;  %s240_s19 = scalar_lea.sflag [#allocation9], %s218_s11 }
  0x20   : > { %s253_s17 = sshll.u32 %s243_s7, 4  ;;  %262 = sbr.rel (%p259_p13) target bundleno = 557 (0x22d), region = 36  ;;  %s254_s17 = int_to_ptr.vmem [resolvable:$true] %s253_s17 }
  0x21   : > { %578 = dma.hbm_to_vmem [thread:$0]  (!%p900_p10), %s252_s15, 128, %s254_s17, %s240_s19  }
  0x22   : > { %s264_s20 = sand.u32 (!%p259_p13), 1, %s761_s21  }
  0x23   : > { %s556_s0 = sshll.u32 (!%p259_p13), %s264_s20, 3  ;;  %s265_s2 = scalar_lea.sflag (!%p259_p13), [#allocation7], %s264_s20 }
  0x24   : > { %s914_s29 = scalar_lea.vmem (!%p259_p13), [#allocation6], %s556_s0 }
  0x25   : > { %748 = dma.done.wait (%p880_p7), %s265_s2, 128  }
  0x26   : > { %750 = vsyncadd (%p880_p7), %s265_s2, 4294967168  ;;  %s275_s12 = scalar_lea.sflag [#allocation9], %s264_s20  ;;  %s278_s16 = scalar_lea.vmem [#allocation8], %s556_s0 }
  0x27   : > { %752 = dma.done.wait (%p880_p7), %s275_s12, 128  }
  0x28   : > { %754 = vsyncadd (%p880_p7), %s275_s12, 4294967168  ;;  %p318_p0 = scmp.lt.s32.totalorder %s773_s24, 2  ;;  %p561_p1 = scmp.ne.s32.totalorder %s769_s23, 0 }
  0x2a   : > { %s1011_s24 = smov (!%p318_p0, %s773_s24), 2  ;;  %333 = sbr.rel (%p561_p1) target bundleno = 51 (0x33), region = 48 }
  0x2b   : > { %s926_s11 = sshll.u32 %s1011_s24, 3 }
  0x2c   : > { %s321_s2 = scalar_lea.vmem %s984_s1, %s926_s11  ;;  %s325_s10 = scalar_lea.vmem %s987_s4, %s926_s11 }
  0x2d   : > { %s329_s15 = scalar_lea.vmem %s988_s5, %s926_s11 }
  0x2f   : > { %vm334_vm0 = vcmask 7168   ;;  %v787_v0 = vmov -inf   ;;  %v788_v1 = vmov 0.0  }
  0x30   : > { %335 = vst.msk [vmem:[#allocation2] sm:$0xff] %vm334_vm0, %v787_v0 }
  0x31   : > { %336 = vst.msk [vmem:[#allocation3] sm:$0xff] %vm334_vm0, %v788_v1 }
  0x32   : > { %337 = vst.msk [vmem:[#allocation4] sm:$0xff] %vm334_vm0, %v788_v1 }
  0x33 PF: > { %v340_v2 = vld [vmem:[%s321_s2] sm:$0xff]  ;;  %v789_v3 = vmov 0   ;;  %s341_s24 = sld [smem:[#allocation5]]  ;;  %v342_v4 = vlaneseq  ;;  %s562_s7 = sshll.u32 %s769_s23, 7  ;;  %v339_v6 = vld [vmem:[%s278_s16] sm:$0xff]  ;;  %vm361_vm3 = vcmask 7168  }
  0x34   : > { %647 = vset.pattern.permute.xlu0 %v789_v3  ;;  %648 = vset.pattern.permute.xlu1 %v789_v3  ;;  %v338_v5 = vld [vmem:[%s914_s29] sm:$0xff]  ;;  %v345_v8 = vstv %s562_s7  ;;  %p563_p2 = scmp.ne.s32.totalorder %s769_s23, 4 }
  0x35   : > { %348 = vperm.xlu0 %647, %v340_v2   ;;  %v343_v7 = vand.u32 127, %v342_v4  ;;  %v351_v9 = vsub.f32 %v339_v6, %v338_v5 }
  0x37   : > { %v346_v11 = vadd.s32 %v345_v8, %v343_v7  ;;  %v365_v18 = vld [vmem:[#allocation2] sm:$0xff] }
  0x38   : > { %v372_v31 = vld [vmem:[#allocation3] sm:$0xff] }
  0x39   : > { %v352_v10 = vstv %s341_s24  ;;  %vm363_vm2 = vcmp.lt.s32.totalorder %v346_v11, 560  ;;  %v356_v26 = vld [vmem:[#allocation4] sm:$0xff] }
  0x3a   : > { %v353_v12 = vmul.f32 %v352_v10, %v351_v9 }
  0xa7   : > { %v349_v13 = vpop.permute.xlu0 %348 }
  0xa8   : > { %vm350_vm1 = vcmp.eq.s32.totalorder %v346_v11, %v349_v13 }
  0xa9   : > { %v354_v14 = vsel %vm350_vm1, %v353_v12, 0.0 }
  0xaa   : > { %v355_v15 = vadd.f32 %v354_v14, %v338_v5 }
  0xac   : > { %v364_v16 = vsel %vm363_vm2, %v355_v15, -inf  ;;  %v357_v17 = vsel %vm350_vm1, %v355_v15, 0.0 }
  0xad   : > { %366 = vmax.xlane.f32.xlu0 %v364_v16 }
 0x120   : > { %v367_v19 = vpop.xlane.xlu0 %366 }
 0x121   : > { %v368_v20 = vmax.f32 %v365_v18, %v367_v19 }
 0x123   : > { %v369_v21 = vsub.f32 %v365_v18, %v368_v20  ;;  %386 = vst.msk [vmem:[#allocation2] sm:$0xff] %vm361_vm3, %v368_v20  ;;  %376 = vperm.xlu1 %648, %v368_v20  }
 0x125   : > { %v370_v29 = vmul.f32 1.442695, %v369_v21 }
 0x14d   : > { %358 = vadd.xlane.f32.xlu1 %v357_v17 }
 0x195   : > { %v377_v22 = vpop.permute.xlu1 %376 }
 0x196   : > { %v379_v23 = vsub.f32 %v364_v16, %v377_v22 }
 0x198   : > { %v380_v24 = vmul.f32 1.442695, %v379_v23 }
 0x19a   : > { %649 = vpow2.f32 %v380_v24 }
 0x19b   : > { %651 = vpow2.f32 %v370_v29 }
 0x1a0   : > { %v650_v25 = vpop.eup %649 }
 0x1a1   : > { %382 = vadd.xlane.f32.xlu2 %v650_v25  ;;  %v652_v30 = vpop.eup %651 }
 0x1a2   : > { %v373_v32 = vmul.f32 %v652_v30, %v372_v31 }
 0x1c0   : > { %v359_v27 = vpop.xlane.xlu1 %358 }
 0x1c1   : > { %v360_v28 = vadd.f32 %v359_v27, %v356_v26 }
 0x1c3   : > { %362 = vst.msk [vmem:[#allocation4] sm:$0xff] %vm361_vm3, %v360_v28 }
 0x213   : > { %390 = sbr.rel (%p563_p2) target bundleno = 557 (0x22d), region = 52 }
 0x214   : > { %v383_v33 = vpop.xlane.xlu2 %382 }
 0x215   : > { %v384_v34 = vadd.f32 %v383_v33, %v373_v32 }
 0x217   : > { %385 = vst.msk [vmem:[#allocation3] sm:$0xff] %vm361_vm3, %v384_v34 }
 0x218   : > { %v396_v35 = vld [vmem:[#allocation4] sm:$0xff]  ;;  %v391_v38 = vld [vmem:[#allocation2] sm:$0xff] }
 0x219   : > { %397 = vst.msk [vmem:[%s325_s10] sm:$0xff] %vm361_vm3, %v396_v35 }
 0x21e   : > { %v392_v36 = vld [vmem:[#allocation3] sm:$0xff] }
 0x21f   : > { %653 = vlog2.f32 %v392_v36 }
 0x225   : > { %v654_v37 = vpop.eup %653 }
 0x226   : > { %v394_v39 = vmul.f32 0.6931472, %v654_v37 }
 0x228   : > { %v395_v40 = vadd.f32 %v394_v39, %v391_v38 }
 0x22a   : > { %v399_v41 = vsub.f32 %v396_v35, %v395_v40 }
 0x22c   : > { %400 = vst.msk [vmem:[%s329_s15] sm:$0xff] %vm361_vm3, %v399_v41 }
 0x22d PF: > { %s23_s27 = sadd.s32 1, %s785_s27   ;;  %s996_s0 = sld [smem:[#allocation12_spill]] }
 0x22e   : > { %p20_p3 = scmp.ge.s32.totalorder %s23_s27, 17   ;;  %s997_s20 = smov %s761_s21 }
 0x22f   : > { %s998_s21 = smov %s765_s22  ;;  %s999_s22 = smov %s890_s14 }
 0x230   : > { %s1000_s23 = smov %s777_s25  ;;  %s1001_s24 = smov %s781_s26 }
 0x231   : > { %s1002_s25 = smov %s1005_s28  ;;  %22 = sbr.rel (!%p20_p3) target bundleno = 10 (0xa), region = 112 }
 0x233   : > { %s1003_s26 = smov %s996_s0 }
 0x236   :  { %434 = vsyncpa [#allocation7], 1 }
 0x237   :  { %436 = vsyncpa [#allocation7 + $0x1], 1 }
 0x238   :  { %437 = vsyncpa [#allocation9], 1 }
 0x239   :  { %439 = vsyncpa [#allocation9 + $0x1], 1 }

</bundles_post_ra>
